<compile_context>
chip_gen: v7x
topology: tpu7x:2x2x1
jax: 0.10.0
libtpu: 0.0.40
codegen_flags: <defaults>
</compile_context>

<pallas_src>
import jax
import jax.numpy as jnp
from jax import lax
from jax.experimental import pallas as pl
from jax.experimental.pallas import tpu as pltpu

_LANE = 128
_SUBLANE = 8


def _round_up(x, m):
    return (x + m - 1) // m * m


# -----------------------------------------------------------------------------
# Parameters (mirrors nn.Linear default init + epsilon sparsity masks)
# -----------------------------------------------------------------------------
def init_raw_params(key, in_dim, hidden=100, eps1=0.5, eps2=0.5):
    """Raw (unpadded, f32) params; weights stored (in_features, out_features)."""

    def linear(k, fan_in, fan_out):
        kw, kb = jax.random.split(k)
        bound = 1.0 / jnp.sqrt(jnp.float32(fan_in))
        w = jax.random.uniform(kw, (fan_in, fan_out), jnp.float32, -bound, bound)
        b = jax.random.uniform(kb, (fan_out,), jnp.float32, -bound, bound)
        return w, b

    # TODO(synk): sp.initializeEpsilonWeightsMask is an external sparse-init
    # library; a Bernoulli mask of matching shape stands in for it here.
    def mask(k, fan_in, fan_out, eps):
        return (jax.random.uniform(k, (fan_in, fan_out)) < eps).astype(jnp.float32)

    k = jax.random.split(key, 5)
    w1, b1 = linear(k[0], in_dim, hidden)
    w2, b2 = linear(k[1], hidden, hidden)
    w3, b3 = linear(k[2], hidden, 1)
    m1 = mask(k[3], in_dim, hidden, eps1)
    m2 = mask(k[4], hidden, hidden, eps2)
    # equivalent of l.weight.data.mul_(mask) at __init__ time
    return {"w1": w1 * m1, "b1": b1, "w2": w2 * m2, "b2": b2, "w3": w3, "b3": b3}


def pack_params(raw):
    """One-time packing into the lane-dense, low-operand kernel layout.

      w1   : (in_dim, 128) bf16  -- l1 weight, hidden width zero-padded 100->128
      w2   : (128, 128)    bf16  -- l2 weight, zero-padded
      misc : (4, 128)      f32   -- row0=b1, row1=b2, row2=w3 row, row3[0]=b3
    l3 is not an MXU matmul (only 1 of 128 output lanes would be real); it is
    computed in-kernel as a VPU multiply against misc[2] + XLU lane reduce.
    """
    w1, b1, w2, b2, w3, b3 = (raw["w1"], raw["b1"], raw["w2"], raw["b2"],
                              raw["w3"], raw["b3"])
    in_dim, hidden = w1.shape
    h_pad = _LANE  # keep at 128: do NOT pad hidden to 256 on 256-wide MXUs
    assert hidden <= h_pad

    w1_p = (jnp.zeros((in_dim, h_pad), jnp.float32)
            .at[:, :hidden].set(w1).astype(jnp.bfloat16))
    w2_p = (jnp.zeros((h_pad, h_pad), jnp.float32)
            .at[:hidden, :hidden].set(w2).astype(jnp.bfloat16))
    misc = jnp.zeros((4, h_pad), jnp.float32)
    misc = misc.at[0, :hidden].set(b1)
    misc = misc.at[1, :hidden].set(b2)
    misc = misc.at[2, :hidden].set(w3[:, 0])
    misc = misc.at[3, 0].set(b3[0])
    return {"w1": w1_p, "w2": w2_p, "misc": misc}


# -----------------------------------------------------------------------------
# Pallas forward
# -----------------------------------------------------------------------------
def critic_forward(x, packed, *, max_tile_b=512,
                   vmem_budget_bytes=24 * 1024 * 1024):
    """Returns mean(softplus(l3(relu(l2(relu(l1(x))))))) as a scalar."""
    B, in_dim = x.shape
    w1, w2, misc = packed["w1"], packed["w2"], packed["misc"]
    assert w1.shape[0] == in_dim, "x feature dim must match packed w1"
    h_pad = w1.shape[1]

    # Size the batch tile from a VMEM budget: weights are resident (constant
    # index_map -> fetched once), the f32 x tile is double-buffered.
    resident = (w1.size + w2.size) * 2 + misc.size * 4
    per_row = 2 * in_dim * x.dtype.itemsize
    cap_rows = max(_SUBLANE, (vmem_budget_bytes - resident) // max(per_row, 1))
    cap_rows = (cap_rows // _SUBLANE) * _SUBLANE
    tile_b = int(min(max_tile_b, cap_rows, _round_up(B, _SUBLANE)))

    # No wrapper-side pad copy of x: ragged last tile is masked in-kernel.
    num_tiles = pl.cdiv(B, tile_b)

    def kernel(x_ref, w1_ref, w2_ref, misc_ref, out_ref):
        i = pl.program_id(0)

        b1 = misc_ref[0:1, :]                   # (1, 128) f32
        b2 = misc_ref[1:2, :]                   # (1, 128) f32
        w3_row = misc_ref[2:3, :]               # (1, 128) f32, lanes >=100 are 0
        b3 = misc_ref[3:4, 0:1]                 # (1, 1)   f32

        # bf16 MXU matmuls with f32 accumulation
        xb = x_ref[...].astype(jnp.bfloat16)    # (tile_b, in_dim)
        h = jnp.dot(xb, w1_ref[...], preferred_element_type=jnp.float32) + b1
        h = jnp.maximum(h, 0.0)
        h = jnp.dot(h.astype(jnp.bfloat16), w2_ref[...],
                    preferred_element_type=jnp.float32) + b2
        h = jnp.maximum(h, 0.0)

        # l3: single real output lane -> VPU multiply + XLU lane reduction
        z = jnp.sum(h * w3_row, axis=-1, keepdims=True) + b3      # (tile_b, 1)

        # numerically stable softplus (exp / log1p run on the EUP)
        sp = jnp.maximum(z, 0.0) + jnp.log1p(jnp.exp(-jnp.abs(z)))

        # mask padded rows of the ragged last tile; per-tile partial sum
        rows = lax.broadcasted_iota(jnp.int32, sp.shape, 0) + i * tile_b
        part = jnp.sum(jnp.where(rows < B, sp, 0.0))
        out_ref[...] = jnp.broadcast_to(part, out_ref.shape).astype(out_ref.dtype)

    flops = 2 * num_tiles * tile_b * h_pad * (in_dim + h_pad) + 4 * B * h_pad
    bytes_accessed = (x.size * x.dtype.itemsize + (w1.size + w2.size) * 2
                      + misc.size * 4 + num_tiles * _SUBLANE * _LANE * 4)

    partials = pl.pallas_call(
        kernel,
        out_shape=jax.ShapeDtypeStruct((num_tiles, _SUBLANE, _LANE), jnp.float32),
        grid_spec=pltpu.PrefetchScalarGridSpec(
            num_scalar_prefetch=0,
            grid=(num_tiles,),
            in_specs=[
                pl.BlockSpec((tile_b, in_dim), lambda i: (i, 0)),   # streamed
                pl.BlockSpec((in_dim, h_pad), lambda i: (0, 0)),    # resident
                pl.BlockSpec((h_pad, h_pad), lambda i: (0, 0)),     # resident
                pl.BlockSpec((4, h_pad), lambda i: (0, 0)),         # resident
            ],
            out_specs=pl.BlockSpec((1, _SUBLANE, _LANE), lambda i: (i, 0, 0)),
        ),
        compiler_params=pltpu.CompilerParams(
            # independent per-tile partial sums -> shardable across both
            # TensorCores on v7x; neutral on single-TC v5e/v6e
            dimension_semantics=("parallel",),
            vmem_limit_bytes=32 * 1024 * 1024),
        cost_estimate=pl.CostEstimate(
            flops=int(flops),
            transcendentals=int(2 * B),
            bytes_accessed=int(bytes_accessed)),
    )(x, w1, w2, misc)

    # tiny wrapper-side reduction over per-tile partial sums -> scalar mean
    return jnp.sum(partials[:, 0, 0]) / B


# -----------------------------------------------------------------------------
# Pure-JAX reference (unpadded f32 params)
# -----------------------------------------------------------------------------
def _reference_forward(x, raw):
    h = jnp.maximum(x @ raw["w1"] + raw["b1"], 0.0)
    h = jnp.maximum(h @ raw["w2"] + raw["b2"], 0.0)
    z = h @ raw["w3"] + raw["b3"]
    sp = jnp.maximum(z, 0.0) + jnp.log1p(jnp.exp(-jnp.abs(z)))   # softplus
    return jnp.mean(sp)


if __name__ == "__main__":
    # small shapes consistent with the module: hidden_dim=32 input,
    # fixed 100 -> 100 -> 1 layer widths from Critic_Network.
    batch, in_dim, hidden = 8, 32, 100

    key = jax.random.PRNGKey(0)
    kx, kp = jax.random.split(key)
    x = jax.random.normal(kx, (batch, in_dim), jnp.float32)

    raw = init_raw_params(kp, in_dim, hidden=hidden, eps1=0.5, eps2=0.5)
    packed = pack_params(raw)

    q = critic_forward(x, packed)
    jax.block_until_ready(q)

    ref = _reference_forward(x, raw)
    assert q.shape == ()
    # bf16 weights/activations on the MXU -> loosened tolerance vs f32 reference
    assert jnp.allclose(q, ref, rtol=2e-2, atol=2e-2), (q, ref)
    print("KERNEL_OK")
</pallas_src>

<mosaic_0001>
module attributes {stable_mosaic.version = 11 : i64} {
  func.func @kernel(%arg0: i32, %arg1: memref<8x32xf32, #tpu.memory_space<vmem>>, %arg2: memref<32x128xbf16, #tpu.memory_space<vmem>>, %arg3: memref<128x128xbf16, #tpu.memory_space<vmem>>, %arg4: memref<4x128xf32, #tpu.memory_space<vmem>>, %arg5: memref<1x8x128xf32, #tpu.memory_space<vmem>>) attributes {dimension_semantics = [#tpu.dimension_semantics<parallel>], iteration_bounds = array<i64: 1>, scalar_prefetch = 0 : i64, scratch_operands = 0 : i64, tpu.core_type = #tpu.core_type<tc>, window_params = [{transform_indices = @transform_0, window_bounds = array<i64: 8, 32>}, {pipeline_mode = #tpu.pipeline_mode<synchronous>, transform_indices = @transform_1, window_bounds = array<i64: 32, 128>}, {pipeline_mode = #tpu.pipeline_mode<synchronous>, transform_indices = @transform_2, window_bounds = array<i64: 128, 128>}, {pipeline_mode = #tpu.pipeline_mode<synchronous>, transform_indices = @transform_3, window_bounds = array<i64: 4, 128>}, {transform_indices = @transform_4, window_bounds = array<i64: 1, 8, 128>}]} {
    %c0 = arith.constant 0 : index
    %c0_0 = arith.constant 0 : index
    %0 = vector.load %arg4[%c0, %c0_0] : memref<4x128xf32, #tpu.memory_space<vmem>>, vector<1x128xf32>
    %c1 = arith.constant 1 : index
    %c0_1 = arith.constant 0 : index
    %1 = vector.load %arg4[%c1, %c0_1] : memref<4x128xf32, #tpu.memory_space<vmem>>, vector<1x128xf32>
    %c2 = arith.constant 2 : index
    %c0_2 = arith.constant 0 : index
    %2 = vector.load %arg4[%c2, %c0_2] : memref<4x128xf32, #tpu.memory_space<vmem>>, vector<1x128xf32>
    %c3 = arith.constant 3 : index
    %c0_3 = arith.constant 0 : index
    %3 = vector.load %arg4[%c3, %c0_3] : memref<4x128xf32, #tpu.memory_space<vmem>>, vector<1x1xf32>
    %c0_4 = arith.constant 0 : index
    %c0_5 = arith.constant 0 : index
    %4 = vector.load %arg1[%c0_4, %c0_5] : memref<8x32xf32, #tpu.memory_space<vmem>>, vector<8x32xf32>
    %5 = arith.truncf %4 : vector<8x32xf32> to vector<8x32xbf16>
    %c0_6 = arith.constant 0 : index
    %c0_7 = arith.constant 0 : index
    %6 = vector.load %arg2[%c0_6, %c0_7] : memref<32x128xbf16, #tpu.memory_space<vmem>>, vector<32x128xbf16>
    %cst = arith.constant dense<0.000000e+00> : vector<8x128xf32>
    %7 = tpu.matmul %5, %6, %cst {dimension_numbers = #tpu.dot_dimension_numbers<[1], [0], [0], [1], [0, 0, 1, 1], [], []>} : vector<8x32xbf16>, vector<32x128xbf16>, vector<8x128xf32> -> vector<8x128xf32>
    %8 = vector.broadcast %0 : vector<1x128xf32> to vector<8x128xf32>
    %9 = arith.addf %7, %8 : vector<8x128xf32>
    %cst_8 = arith.constant 0.000000e+00 : f32
    %10 = vector.broadcast %cst_8 : f32 to vector<8x128xf32>
    %11 = arith.maximumf %9, %10 : vector<8x128xf32>
    %12 = arith.truncf %11 : vector<8x128xf32> to vector<8x128xbf16>
    %c0_9 = arith.constant 0 : index
    %c0_10 = arith.constant 0 : index
    %13 = vector.load %arg3[%c0_9, %c0_10] : memref<128x128xbf16, #tpu.memory_space<vmem>>, vector<128x128xbf16>
    %cst_11 = arith.constant dense<0.000000e+00> : vector<8x128xf32>
    %14 = tpu.matmul %12, %13, %cst_11 {dimension_numbers = #tpu.dot_dimension_numbers<[1], [0], [0], [1], [0, 0, 1, 1], [], []>} : vector<8x128xbf16>, vector<128x128xbf16>, vector<8x128xf32> -> vector<8x128xf32>
    %15 = vector.broadcast %1 : vector<1x128xf32> to vector<8x128xf32>
    %16 = arith.addf %14, %15 : vector<8x128xf32>
    %cst_12 = arith.constant 0.000000e+00 : f32
    %17 = vector.broadcast %cst_12 : f32 to vector<8x128xf32>
    %18 = arith.maximumf %16, %17 : vector<8x128xf32>
    %19 = vector.broadcast %2 : vector<1x128xf32> to vector<8x128xf32>
    %20 = arith.mulf %18, %19 : vector<8x128xf32>
    %cst_13 = arith.constant dense<0.000000e+00> : vector<8xf32>
    %21 = vector.multi_reduction <add>, %20, %cst_13 [1] : vector<8x128xf32> to vector<8xf32>
    %22 = vector.shape_cast %21 : vector<8xf32> to vector<8x1xf32>
    %23 = vector.broadcast %3 : vector<1x1xf32> to vector<8x1xf32>
    %24 = arith.addf %22, %23 : vector<8x1xf32>
    %cst_14 = arith.constant 0.000000e+00 : f32
    %25 = vector.broadcast %cst_14 : f32 to vector<8x1xf32>
    %26 = arith.maximumf %24, %25 : vector<8x1xf32>
    %27 = math.absf %24 : vector<8x1xf32>
    %cst_15 = arith.constant 0.000000e+00 : f32
    %28 = vector.broadcast %cst_15 : f32 to vector<8x1xf32>
    %29 = arith.subf %28, %27 : vector<8x1xf32>
    %30 = math.exp %29 : vector<8x1xf32>
    %31 = math.log1p %30 : vector<8x1xf32>
    %32 = arith.addf %26, %31 : vector<8x1xf32>
    %33 = tpu.iota {dimensions = array<i32: 0>} : vector<8x1xi32>
    %c8_i32 = arith.constant 8 : i32
    %34 = arith.muli %arg0, %c8_i32 : i32
    %35 = vector.broadcast %34 : i32 to vector<8x1xi32>
    %36 = arith.addi %33, %35 : vector<8x1xi32>
    %c8_i32_16 = arith.constant 8 : i32
    %37 = vector.broadcast %c8_i32_16 : i32 to vector<8x1xi32>
    %38 = arith.cmpi slt, %36, %37 : vector<8x1xi32>
    %cst_17 = arith.constant 0.000000e+00 : f32
    %39 = vector.broadcast %cst_17 : f32 to vector<8x1xf32>
    %40 = arith.select %38, %32, %39 : vector<8x1xi1>, vector<8x1xf32>
    %41 = vector.shape_cast %40 : vector<8x1xf32> to vector<1x8x1xf32>
    %cst_18 = arith.constant dense<0.000000e+00> : vector<1xf32>
    %42 = vector.multi_reduction <add>, %41, %cst_18 [1, 2] : vector<1x8x1xf32> to vector<1xf32>
    %43 = vector.shape_cast %42 : vector<1xf32> to vector<1x1x1xf32>
    %44 = vector.extract %43[0, 0, 0] : f32 from vector<1x1x1xf32>
    %45 = vector.broadcast %44 : f32 to vector<1x8x128xf32>
    %c0_19 = arith.constant 0 : index
    %c0_20 = arith.constant 0 : index
    %c0_21 = arith.constant 0 : index
    %46 = vector.load %arg5[%c0_19, %c0_20, %c0_21] : memref<1x8x128xf32, #tpu.memory_space<vmem>>, vector<1x8x128xf32>
    tpu.vector_store %arg5[%c0_19, %c0_20, %c0_21], %45 {strides = array<i32>} : memref<1x8x128xf32, #tpu.memory_space<vmem>>, vector<1x8x128xf32>,
    return
  }
  func.func @transform_0(%arg0: i32) -> (i32, i32) {
    %c0_i32 = arith.constant 0 : i32
    %c0_i32_0 = arith.constant 0 : i32
    return %arg0, %c0_i32 : i32, i32
  }
  func.func @transform_1(%arg0: i32) -> (i32, i32) {
    %c0_i32 = arith.constant 0 : i32
    %c0_i32_0 = arith.constant 0 : i32
    %c0_i32_1 = arith.constant 0 : i32
    return %c0_i32, %c0_i32_0 : i32, i32
  }
  func.func @transform_2(%arg0: i32) -> (i32, i32) {
    %c0_i32 = arith.constant 0 : i32
    %c0_i32_0 = arith.constant 0 : i32
    %c0_i32_1 = arith.constant 0 : i32
    return %c0_i32, %c0_i32_0 : i32, i32
  }
  func.func @transform_3(%arg0: i32) -> (i32, i32) {
    %c0_i32 = arith.constant 0 : i32
    %c0_i32_0 = arith.constant 0 : i32
    %c0_i32_1 = arith.constant 0 : i32
    return %c0_i32, %c0_i32_0 : i32, i32
  }
  func.func @transform_4(%arg0: i32) -> (i32, i32, i32) {
    %c0_i32 = arith.constant 0 : i32
    %c0_i32_0 = arith.constant 0 : i32
    %c0_i32_1 = arith.constant 0 : i32
    return %arg0, %c0_i32, %c0_i32_0 : i32, i32, i32
  }
}

</mosaic_0001>

<bundles_post_ra>
// kernel: tpu_custom_call.1
= control target key start
LH: loop header
LB: loop body
LE: loop exit
PB: predicated region body
PF: predicated region fallthrough
CT: control target
= control target key end

     0   :  { %9 = vsyncpa [#allocation3], 0  ;;  %s574_s0 = inlined_call_operand.hbm [shape: f32[8,32], index: 0, kind: input, shape index: {}]   ;;  %s575_s1 = inlined_call_operand.hbm [shape: bf16[32,128], index: 1, kind: input, shape index: {}]   ;;  %s576_s2 = inlined_call_operand.hbm [shape: bf16[128,128], index: 2, kind: input, shape index: {}]   ;;  %s577_s3 = inlined_call_operand.vmem [shape: f32[4,128], index: 3, kind: input, shape index: {}]   ;;  %s578_s4 = inlined_call_operand.hbm [shape: f32[1,8,128], index: 4, kind: output, shape index: {}]  }
   0x1   :  { %10 = vsyncpa [#allocation6], 0 }
   0x2   :  { %11 = vsyncpa [#allocation4], 0  ;;  %s475_s15 = smov [#allocation5]   ;;  %s381_s19 = scalar_lea.hbm %s575_s1, 256 }
   0x3   :  { %s27_s16 = sshll.u32 %s475_s15, 4  ;;  %p382_p0 = scmp.ne.s32.totalorder %s575_s1, %s381_s19  ;;  %s28_s16 = int_to_ptr.vmem [resolvable:$true] %s27_s16 }
   0x4   :  { %p385_p1 = scmp.lt.u32.totalorder %s381_s19, %s575_s1 }
   0x6   :  { %p387_p2 = pnand %p385_p1, %p382_p0 }
   0x8   :  { %390 = shalt.err (!%p387_p2)
}
   0x9   :  { %s391_s24 = scalar_lea.vmem %s28_s16, 256  ;;  %p396_p4 = scmp.lt.s32.totalorder %s28_s16, %s28_s16 }
   0xa   :  { %p392_p3 = scmp.ne.s32.totalorder %s28_s16, %s391_s24  ;;  %p397_p5 = scmp.lt.s32.totalorder %s391_s24, %s391_s24 }
   0xc   :  { %p398_p6 = por %p397_p5, %p396_p4 }
   0xe   :  { %p399_p7 = pnand %p398_p6, %p392_p3 }
  0x10   :  { %402 = shalt.err (!%p399_p7)
}
  0x11   :  { %s476_s25 = smov 64   ;;  %s477_s26 = smov 4  }
  0x12   :  { %33 = dma.hbm_to_vmem [thread:$0]  %s575_s1, 256, %s28_s16, [#allocation6], %s476_s25, %s476_s25, %s477_s26  }
  0x13   :  { %s478_s29 = smov [#allocation2]   ;;  %s479_s5 = smov [#allocation7]  }
  0x14   :  { %s18_s30 = sshll.u32 %s478_s29, 4  ;;  %s39_s6 = sshll.u32 %s479_s5, 4  ;;  %s19_s30 = int_to_ptr.vmem [resolvable:$true] %s18_s30  ;;  %s40_s6 = int_to_ptr.vmem [resolvable:$true] %s39_s6 }
  0x15   :  { %s403_s9 = scalar_lea.hbm %s574_s0, 128 }
  0x16   :  { %p404_p8 = scmp.ne.s32.totalorder %s574_s0, %s403_s9  ;;  %p407_p9 = scmp.lt.u32.totalorder %s403_s9, %s574_s0 }
  0x18   :  { %p409_p10 = pnand %p407_p9, %p404_p8 }
  0x1a   :  { %412 = shalt.err (!%p409_p10)
}
  0x1b   :  { %s413_s1 = scalar_lea.vmem %s19_s30, 128  ;;  %p418_p12 = scmp.lt.s32.totalorder %s19_s30, %s19_s30 }
  0x1c   :  { %p414_p11 = scmp.ne.s32.totalorder %s19_s30, %s413_s1  ;;  %p419_p13 = scmp.lt.s32.totalorder %s413_s1, %s413_s1 }
  0x1e   :  { %p420_p0 = por %p419_p13, %p418_p12 }
  0x20   :  { %p421_p1 = pnand %p420_p0, %p414_p11 }
  0x22   :  { %424 = shalt.err (!%p421_p1)
}
  0x23   :  { %21 = dma.hbm_to_vmem [thread:$0]  %s574_s0, 128, %s19_s30, [#allocation3]  }
  0x24   :  { %s425_s18 = scalar_lea.hbm %s576_s2, 1024 }
  0x25   :  { %p426_p2 = scmp.ne.s32.totalorder %s576_s2, %s425_s18  ;;  %p429_p3 = scmp.lt.u32.totalorder %s425_s18, %s576_s2 }
  0x27   :  { %p431_p4 = pnand %p429_p3, %p426_p2 }
  0x29   :  { %434 = shalt.err (!%p431_p4)
}
  0x2a   :  { %s435_s23 = scalar_lea.vmem %s40_s6, 1024  ;;  %p440_p6 = scmp.lt.s32.totalorder %s40_s6, %s40_s6 }
  0x2b   :  { %p436_p5 = scmp.ne.s32.totalorder %s40_s6, %s435_s23  ;;  %p441_p7 = scmp.lt.s32.totalorder %s435_s23, %s435_s23 }
  0x2d   :  { %p442_p8 = por %p441_p7, %p440_p6 }
  0x2f   :  { %p443_p9 = pnand %p442_p8, %p436_p5 }
  0x31   :  { %446 = shalt.err (!%p443_p9)
}
  0x32   :  { %45 = dma.hbm_to_vmem [thread:$0]  %s576_s2, 1024, %s40_s6, [#allocation6], %s476_s25, %s476_s25, %s477_s26  }
  0x33   :  { %469 = dma.done.wait [#allocation3], 128  }
  0x34   :  { %470 = vsyncadd [#allocation3], 4294967168 }
  0x35   :  { %471 = dma.done.wait [#allocation6], 1280  }
  0x36   :  { %472 = vsyncadd [#allocation6], 4294966016  ;;  %v480_v0 = vmov 0.0   ;;  %vm481_vm0 = vmmov 0   ;;  %v367_v1 = vld [vmem:[#allocation5] sm:$0xff]   ;;  %v368_v2 = vld [vmem:[#allocation5 + $0x8] sm:$0xff]  }
  0x37   :  { %329 = vmatprep.subr.bf16.mxu0 %v480_v0  ;;  %333 = vmatprep.mubr.msk.bf16.mxu0 %vm481_vm0, %v480_v0  ;;  %v62_v3 = vld [vmem:[#allocation2] sm:$0xff]  ;;  %v369_v4 = vld [vmem:[#allocation7] sm:$0xff]   ;;  %vm84_vm1 = vcmask 261120   ;;  %v371_v7 = vld [vmem:[#allocation7 + $0x10] sm:$0xff]   ;;  %vm273_vm3 = vcmask 7168  }
  0x38   :  { %337 = vmatprep.subr.bf16.mxu1 %v480_v0  ;;  %353 = vmatprep.mubr.msk.bf16.mxu1 %vm481_vm0, %v480_v0  ;;  %v63_v5 = vpack.c.bf16 %v62_v3, %v62_v3  ;;  %v370_v6 = vld [vmem:[#allocation7 + $0x8] sm:$0xff]   ;;  %v372_v8 = vld [vmem:[#allocation7 + $0x18] sm:$0xff]   ;;  %v373_v9 = vld [vmem:[#allocation7 + $0x20] sm:$0xff]  }
  0x39   :  { %330 = vmatpush3.bf16.msra.mxu0 %v367_v1  ;;  %338 = vmatpush3.bf16.msra.mxu1 %v369_v4  ;;  %v374_v10 = vld [vmem:[#allocation7 + $0x28] sm:$0xff]   ;;  %v375_v11 = vld [vmem:[#allocation7 + $0x30] sm:$0xff]   ;;  %v376_v12 = vld [vmem:[#allocation7 + $0x38] sm:$0xff]  }
  0x3a   :  { %331 = vmatprep.subr.bf16.mxu0 %v480_v0  ;;  %339 = vmatprep.subr.bf16.mxu1 %v480_v0  ;;  %v302_v13 = vld [vmem:[%s577_s3] ss:$0 sm:$0xff]  ;;  %v306_v21 = vld [vmem:[%s577_s3 + $0x1] ss:$0 sm:$0xff]  ;;  %v315_v26 = vld [vmem:[%s577_s3 + $0x2] ss:$0 sm:$0xff] }
  0x3b   :  { %v316_v30 = vld [vmem:[%s577_s3 + $0x3] ss:$0 sm:$0xff]  ;;  %s482_s3 = smov [#allocation8]  }
  0x3c   :  { %s292_s6 = sshll.u32 %s482_s3, 4  ;;  %s293_s6 = int_to_ptr.vmem [resolvable:$true] %s292_s6 }
  0x3d   :  { %332 = vmatpush3.bf16.msra.mxu0 %v368_v2  ;;  %340 = vmatpush3.bf16.msra.mxu1 %v370_v6  ;;  %s447_s8 = scalar_lea.vmem %s293_s6, 128  ;;  %p452_p11 = scmp.lt.s32.totalorder %s293_s6, %s293_s6 }
  0x3e   :  { %341 = vmatprep.subr.bf16.mxu1 %v480_v0  ;;  %p448_p10 = scmp.ne.s32.totalorder %s293_s6, %s447_s8  ;;  %p453_p12 = scmp.lt.s32.totalorder %s447_s8, %s447_s8 }
  0x40   :  { %334 = vmatmul.mubr.msk.bf16.vlgmr.msra.gmra.mrb[0].mxu0 %vm84_vm1, %v63_v5  ;;  %p454_p13 = por %p453_p12, %p452_p11 }
  0x41   :  { %342 = vmatpush3.bf16.msra.mxu1 %v371_v7 }
  0x42   :  { %343 = vmatprep.subr.bf16.mxu1 %v480_v0  ;;  %p455_p0 = pnand %p454_p13, %p448_p10 }
  0x45   :  { %344 = vmatpush3.bf16.msra.mxu1 %v372_v8 }
  0x46   :  { %345 = vmatprep.subr.bf16.mxu1 %v480_v0 }
  0x49   :  { %346 = vmatpush3.bf16.msra.mxu1 %v373_v9 }
  0x4a   :  { %347 = vmatprep.subr.bf16.mxu1 %v480_v0 }
  0x4d   :  { %348 = vmatpush3.bf16.msra.mxu1 %v374_v10 }
  0x4e   :  { %349 = vmatprep.subr.bf16.mxu1 %v480_v0 }
  0x51   :  { %350 = vmatpush3.bf16.msra.mxu1 %v375_v11 }
  0x52   :  { %351 = vmatprep.subr.bf16.mxu1 %v480_v0 }
  0x55   :  { %352 = vmatpush3.bf16.msra.mxu1 %v376_v12 }
 0x113   :  { %v122_v14 = vpop.f32.mrb[0].mxu0 }
 0x114   :  { %v123_v15 = vadd.f32 %v302_v13, %v122_v14  ;;  %v335_v16 = vpop.f32.mrb[1].mxu0 }
 0x115   :  { %v125_v17 = vpop.f32.mrb[2].mxu0 }
 0x116   :  { %v128_v18 = vmax.f32 %v123_v15, 0.0  ;;  %v336_v19 = vpop.f32.mrb[3].mxu0 }
 0x118   :  { %v129_v20 = vpack.c.bf16 %v128_v18, %v128_v18 }
 0x11a   :  { %354 = vmatmul.mubr.bf16.vlgmr.msra.gmra.mrb[0].mxu1 %v129_v20 }
 0x1ed   :  { %v232_v22 = vpop.f32.mrb[0].mxu1 }
 0x1ee   :  { %v233_v23 = vadd.f32 %v306_v21, %v232_v22  ;;  %v355_v24 = vpop.f32.mrb[1].mxu1 }
 0x1ef   :  { %v235_v25 = vpop.f32.mrb[2].mxu1 }
 0x1f0   :  { %v238_v27 = vmax.f32 %v233_v23, 0.0  ;;  %v356_v28 = vpop.f32.mrb[3].mxu1 }
 0x1f2   :  { %v243_v29 = vmul.f32 %v315_v26, %v238_v27 }
 0x1f4   :  { %244 = vadd.xlane.f32.xlu0 %v243_v29 }
 0x281   :  { %v245_v31 = vpop.xlane.xlu0 %244 }
 0x282   :  { %v250_v32 = vadd.f32 %v316_v30, %v245_v31 }
 0x284   :  { %v252_v33 = vand.u32 2147483647, %v250_v32  ;;  %v251_v44 = vmax.f32 %v250_v32, 0.0 }
 0x286   :  { %v253_v34 = vsub.f32 0.0, %v252_v33 }
 0x288   :  { %v254_v35 = vmul.f32 1.442695, %v253_v34 }
 0x28a   :  { %377 = vpow2.f32 %v254_v35 }
 0x294   :  { %v378_v36 = vpop.eup %377 }
 0x295   :  { %v256_v37 = vadd.f32 1.0, %v378_v36  ;;  %v259_v38 = vmul.f32 -0.5, %v378_v36  ;;  %v262_v40 = vand.u32 2147483647, %v378_v36 }
 0x297   :  { %379 = vlog2.f32 %v256_v37  ;;  %v260_v39 = vadd.f32 1.0, %v259_v38  ;;  %vm263_vm2 = vcmp.lt.f32.partialorder %v262_v40, 0.0004427343 }
 0x299   :  { %v261_v43 = vmul.f32 %v378_v36, %v260_v39 }
 0x2a1   :  { %v380_v41 = vpop.eup %379 }
 0x2a2   :  { %v258_v42 = vmul.f32 0.6931472, %v380_v41 }
 0x2a4   :  { %v264_v45 = vsel %vm263_vm2, %v261_v43, %v258_v42 }
 0x2a5   :  { %v265_v46 = vadd.f32 %v264_v45, %v251_v44 }
 0x2a7   :  { %v274_v47 = vsel %vm273_vm3, %v265_v46, 0.0 }
 0x2a8   :  { %275 = vadd.xlane.f32.xlu0 %v274_v47 }
 0x335   :  { %v276_v48 = vpop.xlane.xlu0 %275 }
 0x336   :  { %v277_v49 = vrot.slane %v276_v48, 4 }
 0x338   :  { %v278_v50 = vadd.f32 %v277_v49, %v276_v48 }
 0x33a   :  { %v279_v51 = vrot.slane %v278_v50, 2 }
 0x33c   :  { %v280_v52 = vadd.f32 %v279_v51, %v278_v50 }
 0x33e   :  { %v281_v53 = vrot.slane %v280_v52, 1 }
 0x340   :  { %v282_v54 = vadd.f32 %v281_v53, %v280_v52 }
 0x342   :  { %357 = vpush %v282_v54 }
 0x373   :  { %s358_s7 = spop %357 }
 0x374   :  { %v284_v55 = vstv %s358_s7 }
 0x375   :  { %285 = vst [vmem:[#allocation8] sm:$0xff] %v284_v55 }
 0x376   :  { %458 = shalt.err (!%p455_p0)
}
 0x377   :  { %s459_s11 = scalar_lea.hbm %s578_s4, 128 }
 0x378   :  { %p460_p1 = scmp.ne.s32.totalorder %s578_s4, %s459_s11  ;;  %p463_p2 = scmp.lt.u32.totalorder %s459_s11, %s578_s4 }
 0x37a   :  { %p465_p3 = pnand %p463_p2, %p460_p1 }
 0x37c   :  { %468 = shalt.err (!%p465_p3)
}
 0x37d   :  { %295 = dma.vmem_to_hbm [thread:$0]  %s293_s6, 128, %s578_s4, [#allocation4]  }
 0x37e   :  { %473 = dma.done.wait [#allocation4], 128  }
 0x37f   :  { %474 = vsyncadd [#allocation4], 4294967168 }
 0x380   :  { %299 = vsyncpa [#allocation3], 1 }
 0x381   :  { %300 = vsyncpa [#allocation6], 1 }
 0x382   :  { %301 = vsyncpa [#allocation4], 1 }

</bundles_post_ra>
